<compile_context>
chip_gen: v7x
topology: tpu7x:2x2x1
jax: 0.10.0
libtpu: 0.0.40
codegen_flags: <defaults>
</compile_context>

<pallas_src>
import functools

import jax
import jax.numpy as jnp
from jax.experimental import pallas as pl
from jax.experimental.pallas import tpu as pltpu

_LN_EPS = 1e-5
_VMEM_WORKING_BUDGET = 16 * 1024 * 1024   # conservative per-kernel working-set budget
_VMEM_LIMIT_BYTES = 32 * 1024 * 1024      # raise v5e's 16 MiB default; safe on v6e/v7x


def _choose_tm(m, per_row_bytes, resident_bytes):
    """Largest token tile (multiple of 8) whose working set fits the VMEM budget."""
    avail = max(_VMEM_WORKING_BUDGET - resident_bytes, 1 << 20)
    tm = max(8, avail // max(per_row_bytes, 1))
    tm = int(min(tm, 1024, m))
    if tm < m:
        tm = max(8, (tm // 8) * 8)
    return tm


def _compiler_params():
    return pltpu.CompilerParams(dimension_semantics=("parallel",),
                                vmem_limit_bytes=_VMEM_LIMIT_BYTES)


def _layernorm_f32(x_f32, gamma, beta):
    mean = jnp.mean(x_f32, axis=-1, keepdims=True)
    var = jnp.mean(jnp.square(x_f32 - mean), axis=-1, keepdims=True)
    inv = jax.lax.rsqrt(var + _LN_EPS)
    return (x_f32 - mean) * inv * gamma.astype(jnp.float32) + beta.astype(jnp.float32)


# ----------------------------------------------------------------------------- kernels

def _ln_matmul_kernel(x_ref, g_ref, b_ref, w_ref, o_ref):
    # LayerNorm(x) @ W   (qkv projection, no bias)
    x = x_ref[...].astype(jnp.float32)
    xn = _layernorm_f32(x, g_ref[...], b_ref[...])
    y = jnp.dot(xn.astype(w_ref.dtype), w_ref[...], preferred_element_type=jnp.float32)
    o_ref[...] = y.astype(o_ref.dtype)


def _matmul_bias_residual_kernel(a_ref, w_ref, b_ref, res_ref, o_ref):
    # a @ W + b + residual   (attention output projection + skip connection)
    y = jnp.dot(a_ref[...], w_ref[...], preferred_element_type=jnp.float32)
    y = y + b_ref[...].astype(jnp.float32) + res_ref[...].astype(jnp.float32)
    o_ref[...] = y.astype(o_ref.dtype)


def _ln_ffn_residual_kernel(x_ref, g_ref, be_ref, w1_ref, b1_ref, w2_ref, b2_ref, o_ref):
    # relu(LayerNorm(x) @ W1 + b1) @ W2 + b2 + x   (Dropout p=0.0 elided)
    x = x_ref[...].astype(jnp.float32)
    xn = _layernorm_f32(x, g_ref[...], be_ref[...])
    h = jnp.dot(xn.astype(w1_ref.dtype), w1_ref[...], preferred_element_type=jnp.float32)
    h = jnp.maximum(h + b1_ref[...].astype(jnp.float32), 0.0)
    y = jnp.dot(h.astype(w2_ref.dtype), w2_ref[...], preferred_element_type=jnp.float32)
    y = y + b2_ref[...].astype(jnp.float32) + x
    o_ref[...] = y.astype(o_ref.dtype)


def _attn_kernel(q_ref, k_ref, v_ref, o_ref, *, scale):
    q, k, v = q_ref[0], k_ref[0], v_ref[0]                       # (N, dh)
    s = jax.lax.dot_general(q, k, (((1,), (1,)), ((), ())),
                            preferred_element_type=jnp.float32) * scale
    s = s - jnp.max(s, axis=-1, keepdims=True)
    p = jnp.exp(s)
    attn = p / jnp.sum(p, axis=-1, keepdims=True)
    out = jnp.dot(attn.astype(v.dtype), v, preferred_element_type=jnp.float32)
    o_ref[...] = out[None].astype(o_ref.dtype)


def _attn_map_kernel(q_ref, k_ref, v_ref, m_ref, o_ref, *, scale):
    q, k, v = q_ref[0], k_ref[0], v_ref[0]
    s = jax.lax.dot_general(q, k, (((1,), (1,)), ((), ())),
                            preferred_element_type=jnp.float32) * scale
    s = s - jnp.max(s, axis=-1, keepdims=True)
    p = jnp.exp(s)
    attn = p / jnp.sum(p, axis=-1, keepdims=True)
    attn = attn * m_ref[0].astype(jnp.float32)                   # attn = map_attn * attn
    out = jnp.dot(attn.astype(v.dtype), v, preferred_element_type=jnp.float32)
    o_ref[...] = out[None].astype(o_ref.dtype)


# ----------------------------------------------------------------------------- wrappers

def _ln_qkv(x2d, gamma, beta, w_qkv):
    m, d = x2d.shape
    o = w_qkv.shape[1]
    itm = x2d.dtype.itemsize
    w_itm = w_qkv.dtype.itemsize
    resident = d * o * w_itm + 2 * d * 4
    per_row = 2 * d * itm + 2 * o * itm + 4 * (d + o)
    tm = _choose_tm(m, per_row, resident)
    cost = pl.CostEstimate(flops=2 * m * d * o, transcendentals=m,
                           bytes_accessed=m * (d + o) * itm + d * o * w_itm + 2 * d * 4)
    return pl.pallas_call(
        _ln_matmul_kernel,
        out_shape=jax.ShapeDtypeStruct((m, o), x2d.dtype),
        grid=(pl.cdiv(m, tm),),
        in_specs=[
            pl.BlockSpec((tm, d), lambda i: (i, 0)),
            pl.BlockSpec((1, d), lambda i: (0, 0)),
            pl.BlockSpec((1, d), lambda i: (0, 0)),
            pl.BlockSpec((d, o), lambda i: (0, 0)),      # weight stays VMEM-resident
        ],
        out_specs=pl.BlockSpec((tm, o), lambda i: (i, 0)),
        compiler_params=_compiler_params(),
        cost_estimate=cost,
    )(x2d, gamma, beta, w_qkv)


def _attention_core(q, k, v, map_attn, scale):
    bh, n, dh = q.shape
    itm = q.dtype.itemsize
    use_map = map_attn is not None
    map_bytes = bh * n * n * map_attn.dtype.itemsize if use_map else 0
    cost = pl.CostEstimate(flops=4 * bh * n * n * dh, transcendentals=bh * n * n,
                           bytes_accessed=4 * bh * n * dh * itm + map_bytes)
    qkv_spec = pl.BlockSpec((1, n, dh), lambda i: (i, 0, 0))
    if use_map:
        kern = functools.partial(_attn_map_kernel, scale=scale)
        in_specs = [qkv_spec, qkv_spec, qkv_spec,
                    pl.BlockSpec((1, n, n), lambda i: (i, 0, 0))]
        args = (q, k, v, map_attn)
    else:
        kern = functools.partial(_attn_kernel, scale=scale)
        in_specs = [qkv_spec, qkv_spec, qkv_spec]
        args = (q, k, v)
    return pl.pallas_call(
        kern,
        out_shape=jax.ShapeDtypeStruct((bh, n, dh), q.dtype),
        grid=(bh,),
        in_specs=in_specs,
        out_specs=pl.BlockSpec((1, n, dh), lambda i: (i, 0, 0)),
        compiler_params=_compiler_params(),
        cost_estimate=cost,
    )(*args)


def _out_proj_residual(a2d, w, b, res2d):
    m, kdim = a2d.shape
    d = w.shape[1]
    itm = a2d.dtype.itemsize
    w_itm = w.dtype.itemsize
    resident = kdim * d * w_itm + d * 4
    per_row = 2 * kdim * itm + 4 * d * itm + 4 * d
    tm = _choose_tm(m, per_row, resident)
    cost = pl.CostEstimate(flops=2 * m * kdim * d, transcendentals=0,
                           bytes_accessed=m * (kdim + 2 * d) * itm + kdim * d * w_itm + d * 4)
    return pl.pallas_call(
        _matmul_bias_residual_kernel,
        out_shape=jax.ShapeDtypeStruct((m, d), a2d.dtype),
        grid=(pl.cdiv(m, tm),),
        in_specs=[
            pl.BlockSpec((tm, kdim), lambda i: (i, 0)),
            pl.BlockSpec((kdim, d), lambda i: (0, 0)),   # resident weight
            pl.BlockSpec((1, d), lambda i: (0, 0)),
            pl.BlockSpec((tm, d), lambda i: (i, 0)),
        ],
        out_specs=pl.BlockSpec((tm, d), lambda i: (i, 0)),
        compiler_params=_compiler_params(),
        cost_estimate=cost,
    )(a2d, w, b, res2d)


def _ln_ffn_residual(x2d, gamma, beta, w1, b1, w2, b2):
    m, d = x2d.shape
    h = w1.shape[1]
    itm = x2d.dtype.itemsize
    w_itm = w1.dtype.itemsize
    resident = 2 * d * h * w_itm + (h + 3 * d) * 4
    per_row = 4 * d * itm + 4 * h + h * w_itm + 4 * d
    tm = _choose_tm(m, per_row, resident)
    cost = pl.CostEstimate(flops=4 * m * d * h, transcendentals=m,
                           bytes_accessed=2 * m * d * itm + 2 * d * h * w_itm + (h + 3 * d) * 4)
    return pl.pallas_call(
        _ln_ffn_residual_kernel,
        out_shape=jax.ShapeDtypeStruct((m, d), x2d.dtype),
        grid=(pl.cdiv(m, tm),),
        in_specs=[
            pl.BlockSpec((tm, d), lambda i: (i, 0)),
            pl.BlockSpec((1, d), lambda i: (0, 0)),
            pl.BlockSpec((1, d), lambda i: (0, 0)),
            pl.BlockSpec((d, h), lambda i: (0, 0)),      # resident weights/biases
            pl.BlockSpec((1, h), lambda i: (0, 0)),
            pl.BlockSpec((h, d), lambda i: (0, 0)),
            pl.BlockSpec((1, d), lambda i: (0, 0)),
        ],
        out_specs=pl.BlockSpec((tm, d), lambda i: (i, 0)),
        compiler_params=_compiler_params(),
        cost_estimate=cost,
    )(x2d, gamma, beta, w1, b1, w2, b2)


# ----------------------------------------------------------------------------- model

def transformer_forward(x, params, map_attn=None, add_Map=False, compute_dtype=None):
    """x: (B, N, dim) -> (B, N, dim). Mirrors Transformer.forward(x, map_attn, add_Map)."""
    B, N, D = x.shape
    cdt = jnp.dtype(compute_dtype) if compute_dtype is not None else x.dtype
    x2d = x.reshape(B * N, D).astype(cdt)
    for layer in params:
        heads, dh = layer["heads"], layer["dim_head"]
        inner = heads * dh
        scale = dh ** (-0.5)

        # --- PreNorm + Attention + residual ---
        qkv = _ln_qkv(x2d, layer["ln1_g"], layer["ln1_b"], layer["w_qkv"].astype(cdt))
        q, k, v = jnp.split(qkv, 3, axis=-1)

        def to_heads(t):  # 'b n (h d) -> (b h) n d'   (layout plumbing done in XLA)
            return t.reshape(B, N, heads, dh).transpose(0, 2, 1, 3).reshape(B * heads, N, dh)

        q, k, v = to_heads(q), to_heads(k), to_heads(v)

        m = None
        if add_Map and map_attn is not None:
            m = jnp.broadcast_to(map_attn.astype(cdt), (B, heads, N, N)).reshape(B * heads, N, N)

        attn_out = _attention_core(q, k, v, m, scale)
        attn_out = attn_out.reshape(B, heads, N, dh).transpose(0, 2, 1, 3).reshape(B * N, inner)

        if layer["project_out"]:
            x2d = _out_proj_residual(attn_out, layer["w_o"].astype(cdt), layer["b_o"], x2d)
        else:  # to_out = nn.Identity()
            x2d = (attn_out.astype(jnp.float32) + x2d.astype(jnp.float32)).astype(cdt)

        # --- PreNorm + FeedForward + residual ---
        x2d = _ln_ffn_residual(x2d, layer["ln2_g"], layer["ln2_b"],
                               layer["w1"].astype(cdt), layer["b1"],
                               layer["w2"].astype(cdt), layer["b2"])
    return x2d.reshape(B, N, D).astype(x.dtype)


def init_transformer_params(key, dim, depth, num_heads, dim_head, mlp_dim):
    """Master weights in f32; weights stored (in, out) = transpose of nn.Linear.weight."""
    inner = num_heads * dim_head
    project_out = not (num_heads == 1 and dim_head == dim)
    layers = []
    for _ in range(depth):
        key, *ks = jax.random.split(key, 12)
        b_in = 1.0 / (dim ** 0.5)
        b_inner = 1.0 / (inner ** 0.5)
        b_hid = 1.0 / (mlp_dim ** 0.5)
        layers.append(dict(
            heads=num_heads, dim_head=dim_head, project_out=project_out,
            ln1_g=1.0 + 0.1 * jax.random.uniform(ks[0], (1, dim), jnp.float32, -1.0, 1.0),
            ln1_b=0.1 * jax.random.uniform(ks[1], (1, dim), jnp.float32, -1.0, 1.0),
            w_qkv=jax.random.uniform(ks[2], (dim, inner * 3), jnp.float32, -b_in, b_in),
            w_o=jax.random.uniform(ks[3], (inner, dim), jnp.float32, -b_inner, b_inner),
            b_o=jax.random.uniform(ks[4], (1, dim), jnp.float32, -b_inner, b_inner),
            ln2_g=1.0 + 0.1 * jax.random.uniform(ks[5], (1, dim), jnp.float32, -1.0, 1.0),
            ln2_b=0.1 * jax.random.uniform(ks[6], (1, dim), jnp.float32, -1.0, 1.0),
            w1=jax.random.uniform(ks[7], (dim, mlp_dim), jnp.float32, -b_in, b_in),
            b1=jax.random.uniform(ks[8], (1, mlp_dim), jnp.float32, -b_in, b_in),
            w2=jax.random.uniform(ks[9], (mlp_dim, dim), jnp.float32, -b_hid, b_hid),
            b2=jax.random.uniform(ks[10], (1, dim), jnp.float32, -b_hid, b_hid),
        ))
    return layers


def reference_forward(x, params, map_attn=None, add_Map=False):
    """Pure-JAX f32 reference mirroring the PyTorch module."""
    B, N, D = x.shape
    h = x.astype(jnp.float32)

    def ln(t, g, b):
        mu = t.mean(-1, keepdims=True)
        var = ((t - mu) ** 2).mean(-1, keepdims=True)
        return (t - mu) * jax.lax.rsqrt(var + _LN_EPS) * g + b

    for layer in params:
        heads, dh = layer["heads"], layer["dim_head"]
        scale = dh ** (-0.5)
        xn = ln(h, layer["ln1_g"], layer["ln1_b"])
        qkv = xn @ layer["w_qkv"]
        q, k, v = jnp.split(qkv, 3, axis=-1)
        q, k, v = (t.reshape(B, N, heads, dh).transpose(0, 2, 1, 3) for t in (q, k, v))
        dots = jnp.einsum("bhnd,bhmd->bhnm", q, k) * scale
        attn = jax.nn.softmax(dots, axis=-1)
        if add_Map and map_attn is not None:
            attn = map_attn.astype(jnp.float32) * attn
        out = jnp.einsum("bhnm,bhmd->bhnd", attn, v)
        out = out.transpose(0, 2, 1, 3).reshape(B, N, heads * dh)
        if layer["project_out"]:
            out = out @ layer["w_o"] + layer["b_o"]
        h = out + h
        xn2 = ln(h, layer["ln2_g"], layer["ln2_b"])
        ff = jnp.maximum(xn2 @ layer["w1"] + layer["b1"], 0.0) @ layer["w2"] + layer["b2"]
        h = ff + h
    return h.astype(x.dtype)


if __name__ == "__main__":
    key = jax.random.PRNGKey(0)
    kx, kp, km = jax.random.split(key, 3)

    B, N, dim = 2, 8, 32
    depth, num_heads, dim_head, mlp_dim = 2, 4, 16, 64

    x = jax.random.normal(kx, (B, N, dim), jnp.float32)
    params = init_transformer_params(kp, dim, depth, num_heads, dim_head, mlp_dim)
    map_attn = jax.random.uniform(km, (B, num_heads, N, N), jnp.float32)

    with jax.default_matmul_precision("highest"):
        ref = reference_forward(x, params)
        ref_m = reference_forward(x, params, map_attn, True)

    # f32 path, no attention map
    out = jax.block_until_ready(transformer_forward(x, params, None, False))
    assert out.shape == (B, N, dim)
    assert jnp.allclose(out, ref, atol=5e-3, rtol=5e-3), float(jnp.max(jnp.abs(out - ref)))

    # f32 path, add_Map=True
    out_m = jax.block_until_ready(transformer_forward(x, params, map_attn, True))
    assert jnp.allclose(out_m, ref_m, atol=5e-3, rtol=5e-3), float(jnp.max(jnp.abs(out_m - ref_m)))

    # bf16 activation/weight path (MXU-friendly), checked loosely against the f32 reference
    out_bf = jax.block_until_ready(transformer_forward(x, params, None, False,
                                                       compute_dtype=jnp.bfloat16))
    assert out_bf.shape == (B, N, dim)
    assert jnp.allclose(out_bf.astype(jnp.float32), ref, atol=2e-1, rtol=2e-1)

    print("KERNEL_OK")
</pallas_src>

<mosaic_0001>
module attributes {stable_mosaic.version = 11 : i64} {
  func.func @_ln_matmul_kernel(%arg0: i32, %arg1: memref<16x32xf32, #tpu.memory_space<vmem>>, %arg2: memref<1x32xf32, #tpu.memory_space<vmem>>, %arg3: memref<1x32xf32, #tpu.memory_space<vmem>>, %arg4: memref<32x192xf32, #tpu.memory_space<vmem>>, %arg5: memref<16x192xf32, #tpu.memory_space<vmem>>) attributes {dimension_semantics = [#tpu.dimension_semantics<parallel>], iteration_bounds = array<i64: 1>, scalar_prefetch = 0 : i64, scratch_operands = 0 : i64, tpu.core_type = #tpu.core_type<tc>, window_params = [{transform_indices = @transform_0, window_bounds = array<i64: 16, 32>}, {pipeline_mode = #tpu.pipeline_mode<synchronous>, transform_indices = @transform_1, window_bounds = array<i64: 1, 32>}, {pipeline_mode = #tpu.pipeline_mode<synchronous>, transform_indices = @transform_2, window_bounds = array<i64: 1, 32>}, {pipeline_mode = #tpu.pipeline_mode<synchronous>, transform_indices = @transform_3, window_bounds = array<i64: 32, 192>}, {transform_indices = @transform_4, window_bounds = array<i64: 16, 192>}]} {
    %c0 = arith.constant 0 : index
    %c0_0 = arith.constant 0 : index
    %0 = vector.load %arg1[%c0, %c0_0] : memref<16x32xf32, #tpu.memory_space<vmem>>, vector<16x32xf32>
    %c0_1 = arith.constant 0 : index
    %c0_2 = arith.constant 0 : index
    %1 = vector.load %arg2[%c0_1, %c0_2] : memref<1x32xf32, #tpu.memory_space<vmem>>, vector<1x32xf32>
    %c0_3 = arith.constant 0 : index
    %c0_4 = arith.constant 0 : index
    %2 = vector.load %arg3[%c0_3, %c0_4] : memref<1x32xf32, #tpu.memory_space<vmem>>, vector<1x32xf32>
    %cst = arith.constant dense<0.000000e+00> : vector<16xf32>
    %3 = vector.multi_reduction <add>, %0, %cst [1] : vector<16x32xf32> to vector<16xf32>
    %4 = vector.shape_cast %3 : vector<16xf32> to vector<16x1xf32>
    %cst_5 = arith.constant 3.200000e+01 : f32
    %5 = vector.broadcast %cst_5 : f32 to vector<16x1xf32>
    %6 = arith.divf %4, %5 : vector<16x1xf32>
    %7 = vector.broadcast %6 : vector<16x1xf32> to vector<16x32xf32>
    %8 = arith.subf %0, %7 : vector<16x32xf32>
    %9 = arith.mulf %8, %8 : vector<16x32xf32>
    %cst_6 = arith.constant dense<0.000000e+00> : vector<16xf32>
    %10 = vector.multi_reduction <add>, %9, %cst_6 [1] : vector<16x32xf32> to vector<16xf32>
    %11 = vector.shape_cast %10 : vector<16xf32> to vector<16x1xf32>
    %cst_7 = arith.constant 3.200000e+01 : f32
    %12 = vector.broadcast %cst_7 : f32 to vector<16x1xf32>
    %13 = arith.divf %11, %12 : vector<16x1xf32>
    %cst_8 = arith.constant 9.99999974E-6 : f32
    %14 = vector.broadcast %cst_8 : f32 to vector<16x1xf32>
    %15 = arith.addf %13, %14 : vector<16x1xf32>
    %16 = math.rsqrt %15 : vector<16x1xf32>
    %17 = vector.broadcast %6 : vector<16x1xf32> to vector<16x32xf32>
    %18 = arith.subf %0, %17 : vector<16x32xf32>
    %19 = vector.broadcast %16 : vector<16x1xf32> to vector<16x32xf32>
    %20 = arith.mulf %18, %19 : vector<16x32xf32>
    %21 = vector.broadcast %1 : vector<1x32xf32> to vector<16x32xf32>
    %22 = arith.mulf %20, %21 : vector<16x32xf32>
    %23 = vector.broadcast %2 : vector<1x32xf32> to vector<16x32xf32>
    %24 = arith.addf %22, %23 : vector<16x32xf32>
    %c0_9 = arith.constant 0 : index
    %c0_10 = arith.constant 0 : index
    %25 = vector.load %arg4[%c0_9, %c0_10] : memref<32x192xf32, #tpu.memory_space<vmem>>, vector<32x192xf32>
    %cst_11 = arith.constant dense<0.000000e+00> : vector<16x192xf32>
    %26 = tpu.matmul %24, %25, %cst_11 {dimension_numbers = #tpu.dot_dimension_numbers<[1], [0], [0], [1], [0, 0, 1, 1], [], []>} : vector<16x32xf32>, vector<32x192xf32>, vector<16x192xf32> -> vector<16x192xf32>
    %c0_12 = arith.constant 0 : index
    %c0_13 = arith.constant 0 : index
    %27 = vector.load %arg5[%c0_12, %c0_13] : memref<16x192xf32, #tpu.memory_space<vmem>>, vector<16x192xf32>
    tpu.vector_store %arg5[%c0_12, %c0_13], %26 {strides = array<i32>} : memref<16x192xf32, #tpu.memory_space<vmem>>, vector<16x192xf32>,
    return
  }
  func.func @transform_0(%arg0: i32) -> (i32, i32) {
    %c0_i32 = arith.constant 0 : i32
    %c0_i32_0 = arith.constant 0 : i32
    return %arg0, %c0_i32 : i32, i32
  }
  func.func @transform_1(%arg0: i32) -> (i32, i32) {
    %c0_i32 = arith.constant 0 : i32
    %c0_i32_0 = arith.constant 0 : i32
    %c0_i32_1 = arith.constant 0 : i32
    return %c0_i32, %c0_i32_0 : i32, i32
  }
  func.func @transform_2(%arg0: i32) -> (i32, i32) {
    %c0_i32 = arith.constant 0 : i32
    %c0_i32_0 = arith.constant 0 : i32
    %c0_i32_1 = arith.constant 0 : i32
    return %c0_i32, %c0_i32_0 : i32, i32
  }
  func.func @transform_3(%arg0: i32) -> (i32, i32) {
    %c0_i32 = arith.constant 0 : i32
    %c0_i32_0 = arith.constant 0 : i32
    %c0_i32_1 = arith.constant 0 : i32
    return %c0_i32, %c0_i32_0 : i32, i32
  }
  func.func @transform_4(%arg0: i32) -> (i32, i32) {
    %c0_i32 = arith.constant 0 : i32
    %c0_i32_0 = arith.constant 0 : i32
    return %arg0, %c0_i32 : i32, i32
  }
}

</mosaic_0001>

<bundles_post_ra>
// kernel: tpu_custom_call.1
= control target key start
LH: loop header
LB: loop body
LE: loop exit
PB: predicated region body
PF: predicated region fallthrough
CT: control target
= control target key end

     0   :  { %9 = vsyncpa [#allocation3], 0  ;;  %s395_s0 = inlined_call_operand.hbm [shape: f32[16,32], index: 0, kind: input, shape index: {}]   ;;  %s396_s1 = inlined_call_operand.vmem [shape: f32[1,32], index: 1, kind: input, shape index: {}]   ;;  %s397_s2 = inlined_call_operand.vmem [shape: f32[1,32], index: 2, kind: input, shape index: {}]   ;;  %s398_s3 = inlined_call_operand.hbm [shape: f32[32,192], index: 3, kind: input, shape index: {}]   ;;  %s399_s4 = inlined_call_operand.hbm [shape: f32[16,192], index: 4, kind: output, shape index: {}]  }
   0x1   :  { %10 = vsyncpa [#allocation6], 0 }
   0x2   :  { %11 = vsyncpa [#allocation4], 0  ;;  %s308_s15 = smov [#allocation2]   ;;  %s236_s19 = scalar_lea.hbm %s395_s0, 256 }
   0x3   :  { %s17_s16 = sshll.u32 %s308_s15, 4  ;;  %p237_p0 = scmp.ne.s32.totalorder %s395_s0, %s236_s19  ;;  %s18_s16 = int_to_ptr.vmem [resolvable:$true] %s17_s16 }
   0x4   :  { %p240_p1 = scmp.lt.u32.totalorder %s236_s19, %s395_s0 }
   0x6   :  { %p242_p2 = pnand %p240_p1, %p237_p0 }
   0x8   :  { %245 = shalt.err (!%p242_p2)
}
   0x9   :  { %s246_s24 = scalar_lea.vmem %s18_s16, 256  ;;  %p251_p4 = scmp.lt.s32.totalorder %s18_s16, %s18_s16 }
   0xa   :  { %p247_p3 = scmp.ne.s32.totalorder %s18_s16, %s246_s24  ;;  %p252_p5 = scmp.lt.s32.totalorder %s246_s24, %s246_s24 }
   0xc   :  { %p253_p6 = por %p252_p5, %p251_p4 }
   0xe   :  { %p254_p7 = pnand %p253_p6, %p247_p3 }
  0x10   :  { %257 = shalt.err (!%p254_p7)
}
  0x11   :  { %s309_s25 = smov 128   ;;  %s310_s26 = smov 8  }
  0x12   :  { %23 = dma.hbm_to_vmem [thread:$0]  %s395_s0, 256, %s18_s16, [#allocation3], %s309_s25, %s309_s25, %s310_s26  }
  0x13   :  { %s311_s29 = smov [#allocation5]   ;;  %s258_s7 = scalar_lea.hbm %s398_s3, 1024 }
  0x14   :  { %s33_s30 = sshll.u32 %s311_s29, 4  ;;  %p259_p8 = scmp.ne.s32.totalorder %s398_s3, %s258_s7  ;;  %s34_s30 = int_to_ptr.vmem [resolvable:$true] %s33_s30 }
  0x15   :  { %p262_p9 = scmp.lt.u32.totalorder %s258_s7, %s398_s3 }
  0x17   :  { %p264_p10 = pnand %p262_p9, %p259_p8 }
  0x19   :  { %267 = shalt.err (!%p264_p10)
}
  0x1a   :  { %s268_s12 = scalar_lea.vmem %s34_s30, 1024  ;;  %p273_p12 = scmp.lt.s32.totalorder %s34_s30, %s34_s30 }
  0x1b   :  { %p269_p11 = scmp.ne.s32.totalorder %s34_s30, %s268_s12  ;;  %p274_p13 = scmp.lt.s32.totalorder %s268_s12, %s268_s12 }
  0x1d   :  { %p275_p0 = por %p274_p13, %p273_p12 }
  0x1f   :  { %p276_p1 = pnand %p275_p0, %p269_p11 }
  0x21   :  { %279 = shalt.err (!%p276_p1)
}
  0x22   :  { %s312_s0 = smov 256   ;;  %s313_s13 = smov 16  }
  0x23   :  { %39 = dma.hbm_to_vmem [thread:$0]  %s398_s3, 1024, %s34_s30, [#allocation6], %s312_s0, %s312_s0, %s313_s13  }
  0x24   :  { %302 = dma.done.wait [#allocation3], 256  }
  0x25   :  { %303 = vsyncadd [#allocation3], 4294967040 }
  0x26   :  { %304 = dma.done.wait [#allocation6], 1024  }
  0x27   :  { %305 = vsyncadd [#allocation6], 4294966272  ;;  %vm50_vm0 = vcmask 261120   ;;  %v46_v0 = vld [vmem:[#allocation2] sm:$0xff]  ;;  %v47_v1 = vld [vmem:[#allocation2 + $0x8] sm:$0xff]  ;;  %v314_v21 = vmov 0.0  }
  0x28   :  { %v51_v2 = vsel %vm50_vm0, %v46_v0, 0.0  ;;  %v54_v3 = vsel %vm50_vm0, %v47_v1, 0.0  ;;  %v95_v14 = vld [vmem:[#allocation5 + $0x8] sm:$0xff]  ;;  %v97_v15 = vld [vmem:[#allocation5 + $0x18] sm:$0xff]  ;;  %v94_v16 = vld [vmem:[#allocation5] sm:$0xff]  ;;  %172 = vmatprep.mubr.f32.mxu0 %v314_v21  ;;  %178 = vmatprep.mubr.f32.mxu1 %v314_v21  ;;  %vm186_vm1 = vcmask 523264  }
  0x29   :  { %52 = vadd.xlane.f32.xlu0 %v51_v2  ;;  %v212_v17 = vpack.c.bf16 %v97_v15, %v95_v14  ;;  %v96_v18 = vld [vmem:[#allocation5 + $0x10] sm:$0xff]  ;;  %v99_v19 = vld [vmem:[#allocation5 + $0x28] sm:$0xff]  ;;  %v101_v20 = vld [vmem:[#allocation5 + $0x38] sm:$0xff] }
  0x2a   :  { %v214_v22 = vpack.c.bf16 %v96_v18, %v94_v16  ;;  %v216_v23 = vpack.c.bf16 %v101_v20, %v99_v19  ;;  %v98_v24 = vld [vmem:[#allocation5 + $0x20] sm:$0xff]  ;;  %v100_v25 = vld [vmem:[#allocation5 + $0x30] sm:$0xff] }
  0x2b   :  { %213 = vmatprep.subr.bf16.mxu0 %v212_v17  ;;  %220 = vmatprep.subr.bf16.mxu1 %v212_v17  ;;  %v218_v26 = vpack.c.bf16 %v100_v25, %v98_v24  ;;  %v208_v34 = vld [vmem:[%s396_s1] ss:$0 sm:$0xff]  ;;  %s315_s1 = smov [#allocation7]  }
  0x2c   :  { %215 = vmatpush1.bf16.msra.mxu0 %v214_v22  ;;  %222 = vmatpush1.bf16.msra.mxu1 %v214_v22  ;;  %v209_v36 = vld [vmem:[%s397_s2] ss:$0 sm:$0xff]  ;;  %s195_s19 = sshll.u32 %s315_s1, 4  ;;  %s196_s19 = int_to_ptr.vmem [resolvable:$true] %s195_s19 }
  0x2d   :  { %55 = vadd.xlane.f32.xlu0 %v54_v3  ;;  %217 = vmatprep.subr.bf16.mxu0 %v216_v23  ;;  %s280_s2 = scalar_lea.vmem %s196_s19, 512  ;;  %p285_p3 = scmp.lt.s32.totalorder %s196_s19, %s196_s19 }
  0x2e   :  { %221 = vmatprep.subr.bf16.mxu1 %v216_v23  ;;  %p281_p2 = scmp.ne.s32.totalorder %s196_s19, %s280_s2  ;;  %p286_p4 = scmp.lt.s32.totalorder %s280_s2, %s280_s2 }
  0x30   :  { %219 = vmatpush1.bf16.msra.mxu0 %v218_v26  ;;  %223 = vmatpush1.bf16.msra.mxu1 %v218_v26  ;;  %p287_p5 = por %p286_p4, %p285_p3 }
  0x32   :  { %p288_p6 = pnand %p287_p5, %p281_p2 }
  0xb6   :  { %v53_v4 = vpop.xlane.xlu0 %52 }
  0xb7   :  { %v58_v5 = vmul.f32 0.03125, %v53_v4 }
  0xb9   :  { %v60_v6 = vsub.f32 %v46_v0, %v58_v5 }
  0xba   :  { %v56_v7 = vpop.xlane.xlu0 %55 }
  0xbb   :  { %v59_v8 = vmul.f32 0.03125, %v56_v7  ;;  %v62_v9 = vmul.f32 %v60_v6, %v60_v6 }
  0xbd   :  { %v61_v10 = vsub.f32 %v47_v1, %v59_v8  ;;  %v64_v11 = vsel %vm50_vm0, %v62_v9, 0.0 }
  0xbe   :  { %65 = vadd.xlane.f32.xlu1 %v64_v11 }
  0xbf   :  { %v63_v12 = vmul.f32 %v61_v10, %v61_v10 }
  0xc1   :  { %v67_v13 = vsel %vm50_vm0, %v63_v12, 0.0 }
  0xc2   :  { %68 = vadd.xlane.f32.xlu1 %v67_v13 }
 0x14b   :  { %v66_v27 = vpop.xlane.xlu1 %65 }
 0x14c   :  { %v70_v28 = vmul.f32 0.03125, %v66_v27 }
 0x14e   :  { %v72_v29 = vadd.f32 1e-05, %v70_v28 }
 0x14f   :  { %v69_v30 = vpop.xlane.xlu1 %68 }
 0x150   :  { %232 = vrsqrt.f32 %v72_v29  ;;  %v71_v31 = vmul.f32 0.03125, %v69_v30 }
 0x152   :  { %v73_v32 = vadd.f32 1e-05, %v71_v31 }
 0x154   :  { %234 = vrsqrt.f32 %v73_v32 }
 0x15a   :  { %v233_v33 = vpop.eup %232 }
 0x15b   :  { %v76_v35 = vmul.f32 %v233_v33, %v60_v6 }
 0x15d   :  { %v84_v37 = vmul.f32 %v208_v34, %v76_v35 }
 0x15e   :  { %v235_v38 = vpop.eup %234 }
 0x15f   :  { %v92_v39 = vadd.f32 %v209_v36, %v84_v37  ;;  %v77_v40 = vmul.f32 %v235_v38, %v61_v10 }
 0x161   :  { %210 = vmatmul.mubr.msk.f32.vlgmr.msra.gmra.mrb[0].mxu0 %vm50_vm0, %v92_v39  ;;  %v85_v41 = vmul.f32 %v208_v34, %v77_v40 }
 0x163   :  { %v93_v42 = vadd.f32 %v209_v36, %v85_v41 }
 0x165   :  { %211 = vmatmul.mubr.msk.f32.vlgmr.msra.gmra.mrb[0].mxu1 %vm50_vm0, %v93_v42 }
 0x234   :  { %v174_v43 = vpop.f32.mrb[0].mxu0 }
 0x235   :  { %185 = vst [vmem:[#allocation7] sm:$0xff] %v174_v43  ;;  %v176_v44 = vpop.f32.mrb[1].mxu0 }
 0x236   :  { %187 = vst.msk [vmem:[#allocation7 + $0x8] sm:$0xff] %vm186_vm1, %v176_v44 }
 0x238   :  { %v180_v45 = vpop.f32.mrb[0].mxu1 }
 0x239   :  { %188 = vst [vmem:[#allocation7 + $0x10] sm:$0xff] %v180_v45  ;;  %v182_v46 = vpop.f32.mrb[1].mxu1 }
 0x23a   :  { %189 = vst.msk [vmem:[#allocation7 + $0x18] sm:$0xff] %vm186_vm1, %v182_v46 }
 0x23b   :  { %291 = shalt.err (!%p288_p6)
}
 0x23c   :  { %s292_s22 = scalar_lea.hbm %s399_s4, 512 }
 0x23d   :  { %p293_p7 = scmp.ne.s32.totalorder %s399_s4, %s292_s22  ;;  %p296_p8 = scmp.lt.u32.totalorder %s292_s22, %s399_s4 }
 0x23f   :  { %p298_p9 = pnand %p296_p8, %p293_p7 }
 0x241   :  { %301 = shalt.err (!%p298_p9)
}
 0x242   :  { %201 = dma.vmem_to_hbm [thread:$0]  %s196_s19, 512, %s399_s4, [#allocation4], %s312_s0, %s312_s0, %s313_s13  }
 0x243   :  { %306 = dma.done.wait [#allocation4], 512  }
 0x244   :  { %307 = vsyncadd [#allocation4], 4294966784 }
 0x245   :  { %205 = vsyncpa [#allocation3], 1 }
 0x246   :  { %206 = vsyncpa [#allocation6], 1 }
 0x247   :  { %207 = vsyncpa [#allocation4], 1 }

</bundles_post_ra>
